<compile_context>
chip_gen: v7x
topology: tpu7x:2x2x1
jax: 0.10.0
libtpu: 0.0.40
codegen_flags: <defaults>
</compile_context>

<pallas_src>
import functools

import jax
import jax.numpy as jnp
from jax.experimental import pallas as pl
from jax.experimental.pallas import tpu as pltpu


def _round_up(n, m):
    return ((n + m - 1) // m) * m


# ----------------------------------------------------------------------------- kernel
def _mhn_kernel(
    x_ref,        # (TB, IN)           bf16
    w_t1_ref,     # (IN, H_PAD)        bf16  shared layer 1
    w_t2_ref,     # (H_PAD, H_PAD)     bf16  shared layer 2
    w_h1_ref,     # (H_PAD, HC_PAD)    bf16  fused head layer 1 (d|v|n side by side)
    w_h2_ref,     # (HC_PAD, OUT_PAD)  bf16  fused head layer 2 (block-diagonal)
    b_ref,        # (8, WMAX) f32  rows: 0=trunk b1, 1=trunk b2, 2=fused head b1, 3=fused head b2
    out_ref,      # (TB, OUT_PAD) f32 packed softmax outputs dec|vote|nom (padding lanes sliced off)
    *,
    h_pad,
    hc_pad,
    out_pad,
    seg_bounds,   # ((0, dec), (dec, dec+vote), (dec+vote, dec+vote+nom))
):
    wdt = w_t1_ref.dtype

    # ---- shared trunk: Linear -> ReLU -> Linear -> ReLU (bf16 operands, f32 accumulate) ----
    h = jnp.dot(x_ref[...], w_t1_ref[...], preferred_element_type=jnp.float32)
    h = jnp.maximum(h + b_ref[0:1, :h_pad], 0.0)
    h = jnp.dot(h.astype(wdt), w_t2_ref[...], preferred_element_type=jnp.float32)
    h = jnp.maximum(h + b_ref[1:2, :h_pad], 0.0)

    # ---- fused head layer 1 (one matmul for all three heads) ----
    z = jnp.dot(h.astype(wdt), w_h1_ref[...], preferred_element_type=jnp.float32)
    z = jnp.maximum(z + b_ref[2:3, :hc_pad], 0.0)

    # ---- fused head layer 2 (block-diagonal) -> packed logits ----
    logits = jnp.dot(z.astype(wdt), w_h2_ref[...], preferred_element_type=jnp.float32)
    logits = logits + b_ref[3:4, :out_pad]

    # ---- per-segment numerically-stable softmax with a SINGLE exp over the tile ----
    lane = jax.lax.broadcasted_iota(jnp.int32, logits.shape, 1)
    masks = [(lane >= start) & (lane < stop) for start, stop in seg_bounds]

    # composite per-lane max (padding lanes keep 0 -> exp(0-0)=1 there; sliced away later)
    m_comp = jnp.zeros_like(logits)
    for mask in masks:
        seg_max = jnp.max(jnp.where(mask, logits, -jnp.inf), axis=-1, keepdims=True)
        m_comp = jnp.where(mask, seg_max, m_comp)

    e = jnp.exp(logits - m_comp)                       # one exp over all 128 lanes

    denom = jnp.ones_like(logits)
    for mask in masks:
        seg_sum = jnp.sum(jnp.where(mask, e, 0.0), axis=-1, keepdims=True)
        denom = jnp.where(mask, seg_sum, denom)

    out_ref[...] = e / denom                           # exact divide: rows sum to 1


# ----------------------------------------------------------------------- param packing
def pack_params(params, input_size, hidden_size, num_players, weight_dtype=jnp.bfloat16):
    """Fuse + pad the per-layer params into the 5 arrays the kernel consumes."""
    dec = num_players * 2 * 3 + 1
    vote = num_players
    nom = num_players + 1

    h_pad = _round_up(hidden_size, 128)
    hc_pad = _round_up(3 * hidden_size, 128)       # compact head packing (128 here, not 384)
    out_dim = dec + vote + nom
    out_pad = _round_up(out_dim, 128)
    wmax = max(h_pad, hc_pad, out_pad)

    def pad2(a, rows, cols):
        return jnp.zeros((rows, cols), jnp.float32).at[: a.shape[0], : a.shape[1]].set(a)

    w_t1 = pad2(params["s_w1"], input_size, h_pad)     # x keeps its real feature dim
    w_t2 = pad2(params["s_w2"], h_pad, h_pad)

    # fused head layer-1: head k occupies lanes [k*hidden, (k+1)*hidden)
    w_h1 = jnp.zeros((h_pad, hc_pad), jnp.float32)
    w_h1 = w_h1.at[:hidden_size, 0 * hidden_size : 1 * hidden_size].set(params["d_w1"])
    w_h1 = w_h1.at[:hidden_size, 1 * hidden_size : 2 * hidden_size].set(params["v_w1"])
    w_h1 = w_h1.at[:hidden_size, 2 * hidden_size : 3 * hidden_size].set(params["n_w1"])

    # fused head layer-2: block-diagonal so each head only sees its own hidden segment
    w_h2 = jnp.zeros((hc_pad, out_pad), jnp.float32)
    w_h2 = w_h2.at[0 * hidden_size : 1 * hidden_size, 0:dec].set(params["d_w2"])
    w_h2 = w_h2.at[1 * hidden_size : 2 * hidden_size, dec : dec + vote].set(params["v_w2"])
    w_h2 = w_h2.at[2 * hidden_size : 3 * hidden_size, dec + vote : dec + vote + nom].set(
        params["n_w2"]
    )

    biases = jnp.zeros((8, wmax), jnp.float32)
    biases = biases.at[0, :hidden_size].set(params["s_b1"][0])
    biases = biases.at[1, :hidden_size].set(params["s_b2"][0])
    biases = biases.at[2, 0 * hidden_size : 1 * hidden_size].set(params["d_b1"][0])
    biases = biases.at[2, 1 * hidden_size : 2 * hidden_size].set(params["v_b1"][0])
    biases = biases.at[2, 2 * hidden_size : 3 * hidden_size].set(params["n_b1"][0])
    biases = biases.at[3, 0:dec].set(params["d_b2"][0])
    biases = biases.at[3, dec : dec + vote].set(params["v_b2"][0])
    biases = biases.at[3, dec + vote : dec + vote + nom].set(params["n_b2"][0])

    packed = dict(
        w_t1=w_t1.astype(weight_dtype),
        w_t2=w_t2.astype(weight_dtype),
        w_h1=w_h1.astype(weight_dtype),
        w_h2=w_h2.astype(weight_dtype),
        biases=biases,                                  # biases stay f32 (added to f32 acc)
    )
    meta = dict(
        input_size=input_size,
        h_pad=h_pad,
        hc_pad=hc_pad,
        out_pad=out_pad,
        wmax=wmax,
        compute_dtype=weight_dtype,
        seg_bounds=((0, dec), (dec, dec + vote), (dec + vote, dec + vote + nom)),
    )
    return packed, meta


# ------------------------------------------------------------------------------ wrapper
def multi_head_network(x, packed, meta, *, block_batch=1024):
    """x: (B, input_size) float32. Returns (declaration, voting, nominating) softmaxes."""
    B, in_dim = x.shape
    h_pad, hc_pad = meta["h_pad"], meta["hc_pad"]
    out_pad, wmax = meta["out_pad"], meta["wmax"]
    seg_bounds = meta["seg_bounds"]
    cdt = meta["compute_dtype"]

    # Tail-aware batch tile (multiple of 8 sublanes): at most tb-1 padded rows, and
    # >=2 "parallel" tiles once B >= 16 so both v7x TensorCores get work.
    tb = min(block_batch, max(8, _round_up(-(-B // 2), 8)))
    b_pad = _round_up(B, tb)

    x_p = jnp.zeros((b_pad, in_dim), cdt).at[:B, :].set(x.astype(cdt))

    kernel = functools.partial(
        _mhn_kernel, h_pad=h_pad, hc_pad=hc_pad, out_pad=out_pad, seg_bounds=seg_bounds
    )

    packed_out = pl.pallas_call(
        kernel,
        out_shape=jax.ShapeDtypeStruct((b_pad, out_pad), jnp.float32),
        grid_spec=pltpu.PrefetchScalarGridSpec(
            num_scalar_prefetch=0,
            grid=(b_pad // tb,),
            in_specs=[
                pl.BlockSpec((tb, in_dim), lambda i: (i, 0)),       # x: blocked over rows
                pl.BlockSpec((in_dim, h_pad), lambda i: (0, 0)),    # weights: VMEM-resident
                pl.BlockSpec((h_pad, h_pad), lambda i: (0, 0)),
                pl.BlockSpec((h_pad, hc_pad), lambda i: (0, 0)),
                pl.BlockSpec((hc_pad, out_pad), lambda i: (0, 0)),
                pl.BlockSpec((8, wmax), lambda i: (0, 0)),          # packed biases (f32)
            ],
            out_specs=pl.BlockSpec((tb, out_pad), lambda i: (i, 0)),
        ),
        compiler_params=pltpu.CompilerParams(
            dimension_semantics=("parallel",),   # batch tiles shard across TCs (v7x)
        ),
    )(x_p, packed["w_t1"], packed["w_t2"], packed["w_h1"], packed["w_h2"], packed["biases"])

    (d0, d1), (v0, v1), (n0, n1) = seg_bounds
    return (
        packed_out[:B, d0:d1],
        packed_out[:B, v0:v1],
        packed_out[:B, n0:n1],
    )


# --------------------------------------------------------------------- init & reference
def init_params(key, input_size, hidden_size, num_players):
    """Deterministic synthetic init. Weights stored as (in, out); biases as (1, out)."""
    dims = {
        "s_1": (input_size, hidden_size),
        "s_2": (hidden_size, hidden_size),
        "d_1": (hidden_size, hidden_size),
        "d_2": (hidden_size, num_players * 2 * 3 + 1),
        "v_1": (hidden_size, hidden_size),
        "v_2": (hidden_size, num_players),
        "n_1": (hidden_size, hidden_size),
        "n_2": (hidden_size, num_players + 1),
    }
    params = {}
    keys = jax.random.split(key, len(dims))
    for (name, (din, dout)), k in zip(dims.items(), keys):
        kw, kb = jax.random.split(k)
        bound = 1.0 / jnp.sqrt(din)  # matches nn.Linear default init scale
        prefix, idx = name.split("_")
        params[f"{prefix}_w{idx}"] = jax.random.uniform(
            kw, (din, dout), jnp.float32, -bound, bound
        )
        params[f"{prefix}_b{idx}"] = jax.random.uniform(
            kb, (1, dout), jnp.float32, -bound, bound
        )
    return params


def reference_forward(x, params, compute_dtype=jnp.float32):
    """Pure-JAX reference mirroring the PyTorch forward.

    compute_dtype=bfloat16 reproduces the kernel's precision policy (bf16 operands,
    f32 accumulation, f32 bias/ReLU/softmax) for a tight numerical check.
    """

    def mm(a, w):
        return jnp.dot(
            a.astype(compute_dtype), w.astype(compute_dtype),
            preferred_element_type=jnp.float32,
        )

    h = jnp.maximum(mm(x, params["s_w1"]) + params["s_b1"], 0.0)
    h = jnp.maximum(mm(h, params["s_w2"]) + params["s_b2"], 0.0)

    def head(p):
        z = jnp.maximum(mm(h, params[f"{p}_w1"]) + params[f"{p}_b1"], 0.0)
        logits = mm(z, params[f"{p}_w2"]) + params[f"{p}_b2"]
        return jax.nn.softmax(logits, axis=1)

    return head("d"), head("v"), head("n")


# ------------------------------------------------------------------------------- main
if __name__ == "__main__":
    input_size, hidden_size, num_players = 32, 32, 4
    batch = 8

    key = jax.random.PRNGKey(0)
    kx, kp = jax.random.split(key)
    x = jax.random.normal(kx, (batch, input_size), jnp.float32)
    params = init_params(kp, input_size, hidden_size, num_players)
    packed, meta = pack_params(params, input_size, hidden_size, num_players)

    dec, vote, nom = multi_head_network(x, packed, meta)
    jax.block_until_ready((dec, vote, nom))

    assert dec.shape == (batch, num_players * 2 * 3 + 1)
    assert vote.shape == (batch, num_players)
    assert nom.shape == (batch, num_players + 1)

    # Tight check vs a reference using the same bf16-operand / f32-accumulate policy.
    dec_r, vote_r, nom_r = reference_forward(x, params, compute_dtype=jnp.bfloat16)
    assert jnp.allclose(dec, dec_r, atol=2e-3)
    assert jnp.allclose(vote, vote_r, atol=2e-3)
    assert jnp.allclose(nom, nom_r, atol=2e-3)

    # Loose semantic check vs the full-f32 reference (difference is only bf16 rounding).
    dec_f, vote_f, nom_f = reference_forward(x, params)
    assert jnp.allclose(dec, dec_f, atol=5e-2)
    assert jnp.allclose(vote, vote_f, atol=5e-2)
    assert jnp.allclose(nom, nom_f, atol=5e-2)

    # Exact-divide softmax: every row sums to 1 within f32 rounding.
    assert jnp.allclose(jnp.sum(dec, axis=1), 1.0, atol=1e-4)
    assert jnp.allclose(jnp.sum(vote, axis=1), 1.0, atol=1e-4)
    assert jnp.allclose(jnp.sum(nom, axis=1), 1.0, atol=1e-4)

    print("KERNEL_OK")
</pallas_src>

<mosaic_0001>
module attributes {stable_mosaic.version = 11 : i64} {
  func.func @_mhn_kernel(%arg0: i32, %arg1: memref<8x32xbf16, #tpu.memory_space<vmem>>, %arg2: memref<32x128xbf16, #tpu.memory_space<vmem>>, %arg3: memref<128x128xbf16, #tpu.memory_space<vmem>>, %arg4: memref<128x128xbf16, #tpu.memory_space<vmem>>, %arg5: memref<128x128xbf16, #tpu.memory_space<vmem>>, %arg6: memref<8x128xf32, #tpu.memory_space<vmem>>, %arg7: memref<8x128xf32, #tpu.memory_space<vmem>>) attributes {dimension_semantics = [#tpu.dimension_semantics<parallel>], iteration_bounds = array<i64: 1>, scalar_prefetch = 0 : i64, scratch_operands = 0 : i64, tpu.core_type = #tpu.core_type<tc>, window_params = [{transform_indices = @transform_0, window_bounds = array<i64: 8, 32>}, {pipeline_mode = #tpu.pipeline_mode<synchronous>, transform_indices = @transform_1, window_bounds = array<i64: 32, 128>}, {pipeline_mode = #tpu.pipeline_mode<synchronous>, transform_indices = @transform_2, window_bounds = array<i64: 128, 128>}, {pipeline_mode = #tpu.pipeline_mode<synchronous>, transform_indices = @transform_3, window_bounds = array<i64: 128, 128>}, {pipeline_mode = #tpu.pipeline_mode<synchronous>, transform_indices = @transform_4, window_bounds = array<i64: 128, 128>}, {pipeline_mode = #tpu.pipeline_mode<synchronous>, transform_indices = @transform_5, window_bounds = array<i64: 8, 128>}, {transform_indices = @transform_6, window_bounds = array<i64: 8, 128>}]} {
    %c0 = arith.constant 0 : index
    %c0_0 = arith.constant 0 : index
    %0 = vector.load %arg1[%c0, %c0_0] : memref<8x32xbf16, #tpu.memory_space<vmem>>, vector<8x32xbf16>
    %c0_1 = arith.constant 0 : index
    %c0_2 = arith.constant 0 : index
    %1 = vector.load %arg2[%c0_1, %c0_2] : memref<32x128xbf16, #tpu.memory_space<vmem>>, vector<32x128xbf16>
    %cst = arith.constant dense<0.000000e+00> : vector<8x128xf32>
    %2 = tpu.matmul %0, %1, %cst {dimension_numbers = #tpu.dot_dimension_numbers<[1], [0], [0], [1], [0, 0, 1, 1], [], []>} : vector<8x32xbf16>, vector<32x128xbf16>, vector<8x128xf32> -> vector<8x128xf32>
    %c0_3 = arith.constant 0 : index
    %c0_4 = arith.constant 0 : index
    %3 = vector.load %arg6[%c0_3, %c0_4] : memref<8x128xf32, #tpu.memory_space<vmem>>, vector<1x128xf32>
    %4 = vector.broadcast %3 : vector<1x128xf32> to vector<8x128xf32>
    %5 = arith.addf %2, %4 : vector<8x128xf32>
    %cst_5 = arith.constant 0.000000e+00 : f32
    %6 = vector.broadcast %cst_5 : f32 to vector<8x128xf32>
    %7 = arith.maximumf %5, %6 : vector<8x128xf32>
    %8 = arith.truncf %7 : vector<8x128xf32> to vector<8x128xbf16>
    %c0_6 = arith.constant 0 : index
    %c0_7 = arith.constant 0 : index
    %9 = vector.load %arg3[%c0_6, %c0_7] : memref<128x128xbf16, #tpu.memory_space<vmem>>, vector<128x128xbf16>
    %cst_8 = arith.constant dense<0.000000e+00> : vector<8x128xf32>
    %10 = tpu.matmul %8, %9, %cst_8 {dimension_numbers = #tpu.dot_dimension_numbers<[1], [0], [0], [1], [0, 0, 1, 1], [], []>} : vector<8x128xbf16>, vector<128x128xbf16>, vector<8x128xf32> -> vector<8x128xf32>
    %c1 = arith.constant 1 : index
    %c0_9 = arith.constant 0 : index
    %11 = vector.load %arg6[%c1, %c0_9] : memref<8x128xf32, #tpu.memory_space<vmem>>, vector<1x128xf32>
    %12 = vector.broadcast %11 : vector<1x128xf32> to vector<8x128xf32>
    %13 = arith.addf %10, %12 : vector<8x128xf32>
    %cst_10 = arith.constant 0.000000e+00 : f32
    %14 = vector.broadcast %cst_10 : f32 to vector<8x128xf32>
    %15 = arith.maximumf %13, %14 : vector<8x128xf32>
    %16 = arith.truncf %15 : vector<8x128xf32> to vector<8x128xbf16>
    %c0_11 = arith.constant 0 : index
    %c0_12 = arith.constant 0 : index
    %17 = vector.load %arg4[%c0_11, %c0_12] : memref<128x128xbf16, #tpu.memory_space<vmem>>, vector<128x128xbf16>
    %cst_13 = arith.constant dense<0.000000e+00> : vector<8x128xf32>
    %18 = tpu.matmul %16, %17, %cst_13 {dimension_numbers = #tpu.dot_dimension_numbers<[1], [0], [0], [1], [0, 0, 1, 1], [], []>} : vector<8x128xbf16>, vector<128x128xbf16>, vector<8x128xf32> -> vector<8x128xf32>
    %c2 = arith.constant 2 : index
    %c0_14 = arith.constant 0 : index
    %19 = vector.load %arg6[%c2, %c0_14] : memref<8x128xf32, #tpu.memory_space<vmem>>, vector<1x128xf32>
    %20 = vector.broadcast %19 : vector<1x128xf32> to vector<8x128xf32>
    %21 = arith.addf %18, %20 : vector<8x128xf32>
    %cst_15 = arith.constant 0.000000e+00 : f32
    %22 = vector.broadcast %cst_15 : f32 to vector<8x128xf32>
    %23 = arith.maximumf %21, %22 : vector<8x128xf32>
    %24 = arith.truncf %23 : vector<8x128xf32> to vector<8x128xbf16>
    %c0_16 = arith.constant 0 : index
    %c0_17 = arith.constant 0 : index
    %25 = vector.load %arg5[%c0_16, %c0_17] : memref<128x128xbf16, #tpu.memory_space<vmem>>, vector<128x128xbf16>
    %cst_18 = arith.constant dense<0.000000e+00> : vector<8x128xf32>
    %26 = tpu.matmul %24, %25, %cst_18 {dimension_numbers = #tpu.dot_dimension_numbers<[1], [0], [0], [1], [0, 0, 1, 1], [], []>} : vector<8x128xbf16>, vector<128x128xbf16>, vector<8x128xf32> -> vector<8x128xf32>
    %c3 = arith.constant 3 : index
    %c0_19 = arith.constant 0 : index
    %27 = vector.load %arg6[%c3, %c0_19] : memref<8x128xf32, #tpu.memory_space<vmem>>, vector<1x128xf32>
    %28 = vector.broadcast %27 : vector<1x128xf32> to vector<8x128xf32>
    %29 = arith.addf %26, %28 : vector<8x128xf32>
    %30 = tpu.iota {dimensions = array<i32: 1>} : vector<8x128xi32>
    %c0_i32 = arith.constant 0 : i32
    %31 = vector.broadcast %c0_i32 : i32 to vector<8x128xi32>
    %32 = arith.cmpi sge, %30, %31 : vector<8x128xi32>
    %c25_i32 = arith.constant 25 : i32
    %33 = vector.broadcast %c25_i32 : i32 to vector<8x128xi32>
    %34 = arith.cmpi slt, %30, %33 : vector<8x128xi32>
    %35 = arith.andi %32, %34 : vector<8x128xi1>
    %c25_i32_20 = arith.constant 25 : i32
    %36 = vector.broadcast %c25_i32_20 : i32 to vector<8x128xi32>
    %37 = arith.cmpi sge, %30, %36 : vector<8x128xi32>
    %c29_i32 = arith.constant 29 : i32
    %38 = vector.broadcast %c29_i32 : i32 to vector<8x128xi32>
    %39 = arith.cmpi slt, %30, %38 : vector<8x128xi32>
    %40 = arith.andi %37, %39 : vector<8x128xi1>
    %c29_i32_21 = arith.constant 29 : i32
    %41 = vector.broadcast %c29_i32_21 : i32 to vector<8x128xi32>
    %42 = arith.cmpi sge, %30, %41 : vector<8x128xi32>
    %c34_i32 = arith.constant 34 : i32
    %43 = vector.broadcast %c34_i32 : i32 to vector<8x128xi32>
    %44 = arith.cmpi slt, %30, %43 : vector<8x128xi32>
    %45 = arith.andi %42, %44 : vector<8x128xi1>
    %cst_22 = arith.constant 0.000000e+00 : f32
    %46 = vector.broadcast %cst_22 : f32 to vector<8x128xf32>
    %cst_23 = arith.constant 0xFF800000 : f32
    %47 = vector.broadcast %cst_23 : f32 to vector<8x128xf32>
    %48 = arith.select %35, %29, %47 : vector<8x128xi1>, vector<8x128xf32>
    %cst_24 = arith.constant dense<0xFF800000> : vector<8xf32>
    %49 = vector.multi_reduction <maximumf>, %48, %cst_24 [1] : vector<8x128xf32> to vector<8xf32>
    %50 = vector.shape_cast %49 : vector<8xf32> to vector<8x1xf32>
    %51 = vector.shape_cast %50 : vector<8x1xf32> to vector<8x1xf32>
    %52 = vector.broadcast %51 : vector<8x1xf32> to vector<8x128xf32>
    %53 = arith.select %35, %52, %46 : vector<8x128xi1>, vector<8x128xf32>
    %cst_25 = arith.constant 0xFF800000 : f32
    %54 = vector.broadcast %cst_25 : f32 to vector<8x128xf32>
    %55 = arith.select %40, %29, %54 : vector<8x128xi1>, vector<8x128xf32>
    %cst_26 = arith.constant dense<0xFF800000> : vector<8xf32>
    %56 = vector.multi_reduction <maximumf>, %55, %cst_26 [1] : vector<8x128xf32> to vector<8xf32>
    %57 = vector.shape_cast %56 : vector<8xf32> to vector<8x1xf32>
    %58 = vector.shape_cast %57 : vector<8x1xf32> to vector<8x1xf32>
    %59 = vector.broadcast %58 : vector<8x1xf32> to vector<8x128xf32>
    %60 = arith.select %40, %59, %53 : vector<8x128xi1>, vector<8x128xf32>
    %cst_27 = arith.constant 0xFF800000 : f32
    %61 = vector.broadcast %cst_27 : f32 to vector<8x128xf32>
    %62 = arith.select %45, %29, %61 : vector<8x128xi1>, vector<8x128xf32>
    %cst_28 = arith.constant dense<0xFF800000> : vector<8xf32>
    %63 = vector.multi_reduction <maximumf>, %62, %cst_28 [1] : vector<8x128xf32> to vector<8xf32>
    %64 = vector.shape_cast %63 : vector<8xf32> to vector<8x1xf32>
    %65 = vector.shape_cast %64 : vector<8x1xf32> to vector<8x1xf32>
    %66 = vector.broadcast %65 : vector<8x1xf32> to vector<8x128xf32>
    %67 = arith.select %45, %66, %60 : vector<8x128xi1>, vector<8x128xf32>
    %68 = arith.subf %29, %67 : vector<8x128xf32>
    %69 = math.exp %68 : vector<8x128xf32>
    %cst_29 = arith.constant 1.000000e+00 : f32
    %70 = vector.broadcast %cst_29 : f32 to vector<8x128xf32>
    %cst_30 = arith.constant 0.000000e+00 : f32
    %71 = vector.broadcast %cst_30 : f32 to vector<8x128xf32>
    %72 = arith.select %35, %69, %71 : vector<8x128xi1>, vector<8x128xf32>
    %cst_31 = arith.constant dense<0.000000e+00> : vector<8xf32>
    %73 = vector.multi_reduction <add>, %72, %cst_31 [1] : vector<8x128xf32> to vector<8xf32>
    %74 = vector.shape_cast %73 : vector<8xf32> to vector<8x1xf32>
    %75 = vector.shape_cast %74 : vector<8x1xf32> to vector<8x1xf32>
    %76 = vector.broadcast %75 : vector<8x1xf32> to vector<8x128xf32>
    %77 = arith.select %35, %76, %70 : vector<8x128xi1>, vector<8x128xf32>
    %cst_32 = arith.constant 0.000000e+00 : f32
    %78 = vector.broadcast %cst_32 : f32 to vector<8x128xf32>
    %79 = arith.select %40, %69, %78 : vector<8x128xi1>, vector<8x128xf32>
    %cst_33 = arith.constant dense<0.000000e+00> : vector<8xf32>
    %80 = vector.multi_reduction <add>, %79, %cst_33 [1] : vector<8x128xf32> to vector<8xf32>
    %81 = vector.shape_cast %80 : vector<8xf32> to vector<8x1xf32>
    %82 = vector.shape_cast %81 : vector<8x1xf32> to vector<8x1xf32>
    %83 = vector.broadcast %82 : vector<8x1xf32> to vector<8x128xf32>
    %84 = arith.select %40, %83, %77 : vector<8x128xi1>, vector<8x128xf32>
    %cst_34 = arith.constant 0.000000e+00 : f32
    %85 = vector.broadcast %cst_34 : f32 to vector<8x128xf32>
    %86 = arith.select %45, %69, %85 : vector<8x128xi1>, vector<8x128xf32>
    %cst_35 = arith.constant dense<0.000000e+00> : vector<8xf32>
    %87 = vector.multi_reduction <add>, %86, %cst_35 [1] : vector<8x128xf32> to vector<8xf32>
    %88 = vector.shape_cast %87 : vector<8xf32> to vector<8x1xf32>
    %89 = vector.shape_cast %88 : vector<8x1xf32> to vector<8x1xf32>
    %90 = vector.broadcast %89 : vector<8x1xf32> to vector<8x128xf32>
    %91 = arith.select %45, %90, %84 : vector<8x128xi1>, vector<8x128xf32>
    %92 = arith.divf %69, %91 : vector<8x128xf32>
    %c0_36 = arith.constant 0 : index
    %c0_37 = arith.constant 0 : index
    %93 = vector.load %arg7[%c0_36, %c0_37] : memref<8x128xf32, #tpu.memory_space<vmem>>, vector<8x128xf32>
    tpu.vector_store %arg7[%c0_36, %c0_37], %92 {strides = array<i32>} : memref<8x128xf32, #tpu.memory_space<vmem>>, vector<8x128xf32>,
    return
  }
  func.func @transform_0(%arg0: i32) -> (i32, i32) {
    %c0_i32 = arith.constant 0 : i32
    %c0_i32_0 = arith.constant 0 : i32
    return %arg0, %c0_i32 : i32, i32
  }
  func.func @transform_1(%arg0: i32) -> (i32, i32) {
    %c0_i32 = arith.constant 0 : i32
    %c0_i32_0 = arith.constant 0 : i32
    %c0_i32_1 = arith.constant 0 : i32
    return %c0_i32, %c0_i32_0 : i32, i32
  }
  func.func @transform_2(%arg0: i32) -> (i32, i32) {
    %c0_i32 = arith.constant 0 : i32
    %c0_i32_0 = arith.constant 0 : i32
    %c0_i32_1 = arith.constant 0 : i32
    return %c0_i32, %c0_i32_0 : i32, i32
  }
  func.func @transform_3(%arg0: i32) -> (i32, i32) {
    %c0_i32 = arith.constant 0 : i32
    %c0_i32_0 = arith.constant 0 : i32
    %c0_i32_1 = arith.constant 0 : i32
    return %c0_i32, %c0_i32_0 : i32, i32
  }
  func.func @transform_4(%arg0: i32) -> (i32, i32) {
    %c0_i32 = arith.constant 0 : i32
    %c0_i32_0 = arith.constant 0 : i32
    %c0_i32_1 = arith.constant 0 : i32
    return %c0_i32, %c0_i32_0 : i32, i32
  }
  func.func @transform_5(%arg0: i32) -> (i32, i32) {
    %c0_i32 = arith.constant 0 : i32
    %c0_i32_0 = arith.constant 0 : i32
    %c0_i32_1 = arith.constant 0 : i32
    return %c0_i32, %c0_i32_0 : i32, i32
  }
  func.func @transform_6(%arg0: i32) -> (i32, i32) {
    %c0_i32 = arith.constant 0 : i32
    %c0_i32_0 = arith.constant 0 : i32
    return %arg0, %c0_i32 : i32, i32
  }
}

</mosaic_0001>

<bundles_post_ra>
// kernel: tpu_custom_call.1
= control target key start
LH: loop header
LB: loop body
LE: loop exit
PB: predicated region body
PF: predicated region fallthrough
CT: control target
= control target key end

     0   :  { %11 = vsyncpa [#allocation3], 0  ;;  %s1060_s0 = inlined_call_operand.hbm [shape: bf16[8,32], index: 0, kind: input, shape index: {}]   ;;  %s1061_s1 = inlined_call_operand.hbm [shape: bf16[32,128], index: 1, kind: input, shape index: {}]   ;;  %s1062_s2 = inlined_call_operand.hbm [shape: bf16[128,128], index: 2, kind: input, shape index: {}]   ;;  %s1063_s3 = inlined_call_operand.hbm [shape: bf16[128,128], index: 3, kind: input, shape index: {}]   ;;  %s1064_s4 = inlined_call_operand.hbm [shape: bf16[128,128], index: 4, kind: input, shape index: {}]   ;;  %s1065_s5 = inlined_call_operand.vmem [shape: f32[8,128], index: 5, kind: input, shape index: {}]   ;;  %s1066_s6 = inlined_call_operand.hbm [shape: f32[8,128], index: 6, kind: output, shape index: {}]  }
   0x1   :  { %12 = vsyncpa [#allocation6], 0 }
   0x2   :  { %13 = vsyncpa [#allocation9], 0 }
   0x3   :  { %14 = vsyncpa [#allocation4], 0  ;;  %s857_s21 = smov [#allocation5]   ;;  %s717_s25 = scalar_lea.hbm %s1061_s1, 256 }
   0x4   :  { %s30_s22 = sshll.u32 %s857_s21, 4  ;;  %p718_p0 = scmp.ne.s32.totalorder %s1061_s1, %s717_s25  ;;  %s31_s22 = int_to_ptr.vmem [resolvable:$true] %s30_s22 }
   0x5   :  { %p721_p1 = scmp.lt.u32.totalorder %s717_s25, %s1061_s1 }
   0x7   :  { %p723_p2 = pnand %p721_p1, %p718_p0 }
   0x9   :  { %726 = shalt.err (!%p723_p2)
}
   0xa   :  { %s727_s30 = scalar_lea.vmem %s31_s22, 256  ;;  %p732_p4 = scmp.lt.s32.totalorder %s31_s22, %s31_s22 }
   0xb   :  { %p728_p3 = scmp.ne.s32.totalorder %s31_s22, %s727_s30  ;;  %p733_p5 = scmp.lt.s32.totalorder %s727_s30, %s727_s30 }
   0xd   :  { %p734_p6 = por %p733_p5, %p732_p4 }
   0xf   :  { %p735_p7 = pnand %p734_p6, %p728_p3 }
  0x11   :  { %738 = shalt.err (!%p735_p7)
}
  0x12   :  { %s858_s7 = smov 64   ;;  %s859_s8 = smov 4  }
  0x13   :  { %36 = dma.hbm_to_vmem [thread:$0]  %s1061_s1, 256, %s31_s22, [#allocation6], %s858_s7, %s858_s7, %s859_s8  }
  0x14   :  { %s860_s11 = smov [#allocation8]   ;;  %s861_s13 = smov [#allocation2]  }
  0x15   :  { %s54_s12 = sshll.u32 %s860_s11, 4  ;;  %s21_s14 = sshll.u32 %s861_s13, 4  ;;  %s55_s12 = int_to_ptr.vmem [resolvable:$true] %s54_s12  ;;  %s22_s14 = int_to_ptr.vmem [resolvable:$true] %s21_s14 }
  0x16   :  { %s739_s17 = scalar_lea.hbm %s1063_s3, 1024 }
  0x17   :  { %p740_p8 = scmp.ne.s32.totalorder %s1063_s3, %s739_s17  ;;  %p743_p9 = scmp.lt.u32.totalorder %s739_s17, %s1063_s3 }
  0x19   :  { %p745_p10 = pnand %p743_p9, %p740_p8 }
  0x1b   :  { %748 = shalt.err (!%p745_p10)
}
  0x1c   :  { %s749_s1 = scalar_lea.vmem %s55_s12, 1024  ;;  %p754_p12 = scmp.lt.s32.totalorder %s55_s12, %s55_s12 }
  0x1d   :  { %p750_p11 = scmp.ne.s32.totalorder %s55_s12, %s749_s1  ;;  %p755_p13 = scmp.lt.s32.totalorder %s749_s1, %s749_s1 }
  0x1f   :  { %p756_p0 = por %p755_p13, %p754_p12 }
  0x21   :  { %p757_p1 = pnand %p756_p0, %p750_p11 }
  0x23   :  { %760 = shalt.err (!%p757_p1)
}
  0x24   :  { %60 = dma.hbm_to_vmem [thread:$0]  %s1063_s3, 1024, %s55_s12, [#allocation9], %s858_s7, %s858_s7, %s859_s8  }
  0x25   :  { %s761_s26 = scalar_lea.hbm %s1060_s0, 64 }
  0x26   :  { %p762_p2 = scmp.ne.s32.totalorder %s1060_s0, %s761_s26  ;;  %p765_p3 = scmp.lt.u32.totalorder %s761_s26, %s1060_s0 }
  0x28   :  { %p767_p4 = pnand %p765_p3, %p762_p2 }
  0x2a   :  { %770 = shalt.err (!%p767_p4)
}
  0x2b   :  { %s771_s9 = scalar_lea.vmem %s22_s14, 64  ;;  %p776_p6 = scmp.lt.s32.totalorder %s22_s14, %s22_s14 }
  0x2c   :  { %p772_p5 = scmp.ne.s32.totalorder %s22_s14, %s771_s9  ;;  %p777_p7 = scmp.lt.s32.totalorder %s771_s9, %s771_s9 }
  0x2e   :  { %p778_p8 = por %p777_p7, %p776_p6 }
  0x30   :  { %p779_p9 = pnand %p778_p8, %p772_p5 }
  0x32   :  { %782 = shalt.err (!%p779_p9)
}
  0x33   :  { %24 = dma.hbm_to_vmem [thread:$0]  %s1060_s0, 64, %s22_s14, [#allocation3]  }
  0x34   :  { %s862_s11 = smov [#allocation7]   ;;  %s863_s13 = smov [#allocation10]  }
  0x35   :  { %s42_s12 = sshll.u32 %s862_s11, 4  ;;  %s66_s15 = sshll.u32 %s863_s13, 4  ;;  %s43_s12 = int_to_ptr.vmem [resolvable:$true] %s42_s12  ;;  %s67_s15 = int_to_ptr.vmem [resolvable:$true] %s66_s15 }
  0x36   :  { %s783_s18 = scalar_lea.hbm %s1062_s2, 1024 }
  0x37   :  { %p784_p10 = scmp.ne.s32.totalorder %s1062_s2, %s783_s18  ;;  %p787_p11 = scmp.lt.u32.totalorder %s783_s18, %s1062_s2 }
  0x39   :  { %p789_p12 = pnand %p787_p11, %p784_p10 }
  0x3b   :  { %792 = shalt.err (!%p789_p12)
}
  0x3c   :  { %s793_s0 = scalar_lea.vmem %s43_s12, 1024  ;;  %p798_p0 = scmp.lt.s32.totalorder %s43_s12, %s43_s12 }
  0x3d   :  { %p794_p13 = scmp.ne.s32.totalorder %s43_s12, %s793_s0  ;;  %p799_p1 = scmp.lt.s32.totalorder %s793_s0, %s793_s0 }
  0x3f   :  { %p800_p2 = por %p799_p1, %p798_p0 }
  0x41   :  { %p801_p3 = pnand %p800_p2, %p794_p13 }
  0x43   :  { %804 = shalt.err (!%p801_p3)
}
  0x44   :  { %48 = dma.hbm_to_vmem [thread:$0]  %s1062_s2, 1024, %s43_s12, [#allocation6], %s858_s7, %s858_s7, %s859_s8  }
  0x45   :  { %s805_s25 = scalar_lea.hbm %s1064_s4, 1024 }
  0x46   :  { %p806_p4 = scmp.ne.s32.totalorder %s1064_s4, %s805_s25  ;;  %p809_p5 = scmp.lt.u32.totalorder %s805_s25, %s1064_s4 }
  0x48   :  { %p811_p6 = pnand %p809_p5, %p806_p4 }
  0x4a   :  { %814 = shalt.err (!%p811_p6)
}
  0x4b   :  { %s815_s30 = scalar_lea.vmem %s67_s15, 1024  ;;  %p820_p8 = scmp.lt.s32.totalorder %s67_s15, %s67_s15 }
  0x4c   :  { %p816_p7 = scmp.ne.s32.totalorder %s67_s15, %s815_s30  ;;  %p821_p9 = scmp.lt.s32.totalorder %s815_s30, %s815_s30 }
  0x4e   :  { %p822_p10 = por %p821_p9, %p820_p8 }
  0x50   :  { %p823_p11 = pnand %p822_p10, %p816_p7 }
  0x52   :  { %826 = shalt.err (!%p823_p11)
}
  0x53   :  { %72 = dma.hbm_to_vmem [thread:$0]  %s1064_s4, 1024, %s67_s15, [#allocation9], %s858_s7, %s858_s7, %s859_s8  }
  0x54   :  { %849 = dma.done.wait [#allocation3], 64  }
  0x55   :  { %850 = vsyncadd [#allocation3], 4294967232 }
  0x56   :  { %851 = dma.done.wait [#allocation6], 1280  }
  0x57   :  { %852 = vsyncadd [#allocation6], 4294966016 }
  0x58   :  { %853 = dma.done.wait [#allocation9], 2048  }
  0x59   :  { %854 = vsyncadd [#allocation9], 4294965248  ;;  %v864_v0 = vmov 0.0   ;;  %vm865_vm0 = vmmov 0   ;;  %v687_v1 = vld [vmem:[#allocation5] sm:$0xff]   ;;  %v688_v2 = vld [vmem:[#allocation5 + $0x8] sm:$0xff]   ;;  %v490_v52 = vlaneseq }
  0x5a   :  { %609 = vmatprep.subr.bf16.mxu0 %v864_v0  ;;  %613 = vmatprep.mubr.msk.bf16.mxu0 %vm865_vm0, %v864_v0  ;;  %v689_v3 = vld [vmem:[#allocation7] sm:$0xff]   ;;  %vm113_vm1 = vcmask 261120   ;;  %v690_v4 = vld [vmem:[#allocation7 + $0x8] sm:$0xff]   ;;  %v691_v6 = vld [vmem:[#allocation7 + $0x10] sm:$0xff]  }
  0x5b   :  { %617 = vmatprep.subr.bf16.mxu1 %v864_v0  ;;  %633 = vmatprep.mubr.msk.bf16.mxu1 %vm865_vm0, %v864_v0  ;;  %v91_v5 = vld [vmem:[#allocation2] sm:$0xf]  ;;  %v692_v7 = vld [vmem:[#allocation7 + $0x18] sm:$0xff]   ;;  %v693_v8 = vld [vmem:[#allocation7 + $0x20] sm:$0xff]   ;;  %v491_v53 = vand.u32 127, %v490_v52 }
  0x5c   :  { %610 = vmatpush3.bf16.msra.mxu0 %v687_v1  ;;  %618 = vmatpush3.bf16.msra.mxu1 %v689_v3  ;;  %v694_v9 = vld [vmem:[#allocation7 + $0x28] sm:$0xff]   ;;  %v695_v10 = vld [vmem:[#allocation7 + $0x30] sm:$0xff]   ;;  %v696_v11 = vld [vmem:[#allocation7 + $0x38] sm:$0xff]  }
  0x5d   :  { %611 = vmatprep.subr.bf16.mxu0 %v864_v0  ;;  %619 = vmatprep.subr.bf16.mxu1 %v864_v0  ;;  %v697_v12 = vld [vmem:[#allocation8] sm:$0xff]   ;;  %v698_v13 = vld [vmem:[#allocation8 + $0x8] sm:$0xff]   ;;  %v699_v14 = vld [vmem:[#allocation8 + $0x10] sm:$0xff]   ;;  %vm498_vm2 = vcmp.ge.s32.totalorder %v491_v53, 29  ;;  %vm499_vm3 = vcmp.lt.s32.totalorder %v491_v53, 34  ;;  %vm493_vm5 = vcmp.lt.s32.totalorder %v491_v53, 25 }
  0x5e   :  { %v700_v15 = vld [vmem:[#allocation8 + $0x18] sm:$0xff]   ;;  %v701_v16 = vld [vmem:[#allocation8 + $0x20] sm:$0xff]   ;;  %v702_v17 = vld [vmem:[#allocation8 + $0x28] sm:$0xff]   ;;  %vm495_vm6 = vcmp.ge.s32.totalorder %v491_v53, 25  ;;  %vm496_vm7 = vcmp.lt.s32.totalorder %v491_v53, 29 }
  0x5f   :  { %v548_v18 = vld [vmem:[%s1065_s5] ss:$0 sm:$0xff]  ;;  %v703_v26 = vld [vmem:[#allocation8 + $0x30] sm:$0xff]   ;;  %v704_v27 = vld [vmem:[#allocation8 + $0x38] sm:$0xff]  }
  0x60   :  { %612 = vmatpush3.bf16.msra.mxu0 %v688_v2  ;;  %620 = vmatpush3.bf16.msra.mxu1 %v690_v4  ;;  %v705_v28 = vld [vmem:[#allocation10] sm:$0xff]   ;;  %v706_v29 = vld [vmem:[#allocation10 + $0x8] sm:$0xff]   ;;  %v707_v30 = vld [vmem:[#allocation10 + $0x10] sm:$0xff]  }
  0x61   :  { %637 = vmatprep.subr.bf16.mxu0 %v864_v0  ;;  %621 = vmatprep.subr.bf16.mxu1 %v864_v0  ;;  %v708_v31 = vld [vmem:[#allocation10 + $0x18] sm:$0xff]   ;;  %v709_v32 = vld [vmem:[#allocation10 + $0x20] sm:$0xff]   ;;  %v710_v33 = vld [vmem:[#allocation10 + $0x28] sm:$0xff]  }
  0x62   :  { %v552_v34 = vld [vmem:[%s1065_s5 + $0x1] ss:$0 sm:$0xff]  ;;  %v711_v42 = vld [vmem:[#allocation10 + $0x30] sm:$0xff]   ;;  %v712_v43 = vld [vmem:[#allocation10 + $0x38] sm:$0xff]  }
  0x63   :  { %614 = vmatmul.mubr.msk.bf16.vlgmr.msra.gmra.mrb[0].mxu0 %vm113_vm1, %v91_v5  ;;  %v561_v44 = vld [vmem:[%s1065_s5 + $0x2] ss:$0 sm:$0xff]  ;;  %v570_v54 = vld [vmem:[%s1065_s5 + $0x3] ss:$0 sm:$0xff]  ;;  %vm1020_vm4 = vmand %vm498_vm2, %vm499_vm3  ;;  %s866_s5 = smov [#allocation11]  }
  0x64   :  { %653 = vmatprep.mubr.msk.bf16.mxu0 %vm865_vm0, %v864_v0  ;;  %622 = vmatpush3.bf16.msra.mxu1 %v691_v6  ;;  %vm1027_vm8 = vmand %vm495_vm6, %vm496_vm7  ;;  %s537_s15 = sshll.u32 %s866_s5, 4  ;;  %s538_s15 = int_to_ptr.vmem [resolvable:$true] %s537_s15 }
  0x65   :  { %623 = vmatprep.subr.bf16.mxu1 %v864_v0  ;;  %638 = vmatpush3.bf16.msra.mxu0 %v697_v12  ;;  %s827_s16 = scalar_lea.vmem %s538_s15, 128  ;;  %p832_p13 = scmp.lt.s32.totalorder %s538_s15, %s538_s15 }
  0x66   :  { %639 = vmatprep.subr.bf16.mxu0 %v864_v0  ;;  %p828_p12 = scmp.ne.s32.totalorder %s538_s15, %s827_s16  ;;  %p833_p0 = scmp.lt.s32.totalorder %s827_s16, %s827_s16 }
  0x68   :  { %624 = vmatpush3.bf16.msra.mxu1 %v692_v7  ;;  %p834_p1 = por %p833_p0, %p832_p13 }
  0x69   :  { %625 = vmatprep.subr.bf16.mxu1 %v864_v0  ;;  %640 = vmatpush3.bf16.msra.mxu0 %v698_v13 }
  0x6a   :  { %641 = vmatprep.subr.bf16.mxu0 %v864_v0  ;;  %p835_p2 = pnand %p834_p1, %p828_p12 }
  0x6c   :  { %626 = vmatpush3.bf16.msra.mxu1 %v693_v8 }
  0x6d   :  { %627 = vmatprep.subr.bf16.mxu1 %v864_v0  ;;  %642 = vmatpush3.bf16.msra.mxu0 %v699_v14 }
  0x6e   :  { %643 = vmatprep.subr.bf16.mxu0 %v864_v0 }
  0x70   :  { %628 = vmatpush3.bf16.msra.mxu1 %v694_v9 }
  0x71   :  { %629 = vmatprep.subr.bf16.mxu1 %v864_v0  ;;  %644 = vmatpush3.bf16.msra.mxu0 %v700_v15 }
  0x72   :  { %645 = vmatprep.subr.bf16.mxu0 %v864_v0 }
  0x74   :  { %630 = vmatpush3.bf16.msra.mxu1 %v695_v10 }
  0x75   :  { %631 = vmatprep.subr.bf16.mxu1 %v864_v0  ;;  %646 = vmatpush3.bf16.msra.mxu0 %v701_v16 }
  0x76   :  { %647 = vmatprep.subr.bf16.mxu0 %v864_v0 }
  0x78   :  { %632 = vmatpush3.bf16.msra.mxu1 %v696_v11 }
  0x79   :  { %657 = vmatprep.subr.bf16.mxu1 %v864_v0  ;;  %648 = vmatpush3.bf16.msra.mxu0 %v702_v17 }
  0x7a   :  { %649 = vmatprep.subr.bf16.mxu0 %v864_v0 }
  0x7d   :  { %650 = vmatpush3.bf16.msra.mxu0 %v703_v26 }
  0x7e   :  { %651 = vmatprep.subr.bf16.mxu0 %v864_v0 }
  0x81   :  { %652 = vmatpush3.bf16.msra.mxu0 %v704_v27 }
 0x136   :  { %v151_v19 = vpop.f32.mrb[0].mxu0 }
 0x137   :  { %v152_v20 = vadd.f32 %v548_v18, %v151_v19  ;;  %v615_v21 = vpop.f32.mrb[1].mxu0 }
 0x138   :  { %v154_v22 = vpop.f32.mrb[2].mxu0 }
 0x139   :  { %v157_v23 = vmax.f32 %v152_v20, 0.0  ;;  %v616_v24 = vpop.f32.mrb[3].mxu0 }
 0x13b   :  { %v158_v25 = vpack.c.bf16 %v157_v23, %v157_v23 }
 0x13d   :  { %634 = vmatmul.mubr.bf16.vlgmr.msra.gmra.mrb[0].mxu1 %v158_v25 }
 0x13e   :  { %673 = vmatprep.mubr.msk.bf16.mxu1 %vm865_vm0, %v864_v0  ;;  %658 = vmatpush3.bf16.msra.mxu1 %v705_v28 }
 0x13f   :  { %659 = vmatprep.subr.bf16.mxu1 %v864_v0 }
 0x142   :  { %660 = vmatpush3.bf16.msra.mxu1 %v706_v29 }
 0x143   :  { %661 = vmatprep.subr.bf16.mxu1 %v864_v0 }
 0x146   :  { %662 = vmatpush3.bf16.msra.mxu1 %v707_v30 }
 0x147   :  { %663 = vmatprep.subr.bf16.mxu1 %v864_v0 }
 0x14a   :  { %664 = vmatpush3.bf16.msra.mxu1 %v708_v31 }
 0x14b   :  { %665 = vmatprep.subr.bf16.mxu1 %v864_v0 }
 0x14e   :  { %666 = vmatpush3.bf16.msra.mxu1 %v709_v32 }
 0x14f   :  { %667 = vmatprep.subr.bf16.mxu1 %v864_v0 }
 0x152   :  { %668 = vmatpush3.bf16.msra.mxu1 %v710_v33 }
 0x153   :  { %669 = vmatprep.subr.bf16.mxu1 %v864_v0 }
 0x156   :  { %670 = vmatpush3.bf16.msra.mxu1 %v711_v42 }
 0x157   :  { %671 = vmatprep.subr.bf16.mxu1 %v864_v0 }
 0x15a   :  { %672 = vmatpush3.bf16.msra.mxu1 %v712_v43 }
 0x210   :  { %v262_v35 = vpop.f32.mrb[0].mxu1 }
 0x211   :  { %v263_v36 = vadd.f32 %v552_v34, %v262_v35  ;;  %v635_v37 = vpop.f32.mrb[1].mxu1 }
 0x212   :  { %v265_v38 = vpop.f32.mrb[2].mxu1 }
 0x213   :  { %v268_v39 = vmax.f32 %v263_v36, 0.0  ;;  %v636_v40 = vpop.f32.mrb[3].mxu1 }
 0x215   :  { %v269_v41 = vpack.c.bf16 %v268_v39, %v268_v39 }
 0x217   :  { %654 = vmatmul.mubr.bf16.vlgmr.msra.gmra.mrb[4].mxu0 %v269_v41 }
 0x2ea   :  { %v373_v45 = vpop.f32.mrb[4].mxu0 }
 0x2eb   :  { %v374_v46 = vadd.f32 %v561_v44, %v373_v45  ;;  %v655_v47 = vpop.f32.mrb[5].mxu0 }
 0x2ec   :  { %v376_v48 = vpop.f32.mrb[6].mxu0 }
 0x2ed   :  { %v379_v49 = vmax.f32 %v374_v46, 0.0  ;;  %v656_v50 = vpop.f32.mrb[7].mxu0 }
 0x2ef   :  { %v380_v51 = vpack.c.bf16 %v379_v49, %v379_v49 }
 0x2f1   :  { %674 = vmatmul.mubr.bf16.vlgmr.msra.gmra.mrb[4].mxu1 %v380_v51 }
 0x3c4   :  { %v484_v55 = vpop.f32.mrb[4].mxu1 }
 0x3c5   :  { %v485_v57 = vadd.f32 %v570_v54, %v484_v55  ;;  %v675_v58 = vpop.f32.mrb[5].mxu1 }
 0x3c6   :  { %v487_v59 = vpop.f32.mrb[6].mxu1 }
 0x3c7   :  { %v676_v60 = vpop.f32.mrb[7].mxu1  ;;  %v509_v61 = vsel %vm1020_vm4, %v485_v57, -inf  ;;  %v501_v62 = vsel %vm493_vm5, %v485_v57, -inf  ;;  %v505_v0 = vsel %vm1027_vm8, %v485_v57, -inf }
 0x3c8   :  { %510 = vmax.xlane.f32.xlu1 %v509_v61  ;;  %502 = vmax.xlane.f32.xlu0 %v501_v62 }
 0x3cc   :  { %506 = vmax.xlane.f32.xlu0 %v505_v0 }
 0x455   :  { %v503_v1 = vpop.xlane.xlu0 %502  ;;  %v511_v4 = vpop.xlane.xlu1 %510 }
 0x456   :  { %v504_v2 = vsel %vm493_vm5, %v503_v1, 0.0 }
 0x459   :  { %v507_v3 = vpop.xlane.xlu0 %506 }
 0x45a   :  { %v508_v5 = vsel %vm1027_vm8, %v507_v3, %v504_v2 }
 0x45b   :  { %v512_v6 = vsel %vm1020_vm4, %v511_v4, %v508_v5 }
 0x45c   :  { %v513_v7 = vsub.f32 %v485_v57, %v512_v6 }
 0x45e   :  { %v514_v8 = vmul.f32 1.442695, %v513_v7 }
 0x460   :  { %713 = vpow2.f32 %v514_v8 }
 0x46a   :  { %v714_v9 = vpop.eup %713 }
 0x46b   :  { %v520_v10 = vsel %vm1027_vm8, %v714_v9, 0.0  ;;  %v516_v11 = vsel %vm493_vm5, %v714_v9, 0.0  ;;  %v524_v12 = vsel %vm1020_vm4, %v714_v9, 0.0 }
 0x46c   :  { %521 = vadd.xlane.f32.xlu0 %v520_v10  ;;  %517 = vadd.xlane.f32.xlu1 %v516_v11 }
 0x470   :  { %525 = vadd.xlane.f32.xlu1 %v524_v12 }
 0x4f9   :  { %v518_v13 = vpop.xlane.xlu1 %517  ;;  %v522_v14 = vpop.xlane.xlu0 %521 }
 0x4fa   :  { %v519_v15 = vsel %vm493_vm5, %v518_v13, 1.0 }
 0x4fb   :  { %v523_v16 = vsel %vm1027_vm8, %v522_v14, %v519_v15 }
 0x4fd   :  { %v526_v17 = vpop.xlane.xlu1 %525 }
 0x4fe   :  { %v527_v18 = vsel %vm1020_vm4, %v526_v17, %v523_v16 }
 0x4ff   :  { %715 = vrcp.f32 %v527_v18 }
 0x509   :  { %v716_v19 = vpop.eup %715 }
 0x50a   :  { %v529_v20 = vmul.f32 %v716_v19, %v714_v9 }
 0x50c   :  { %530 = vst [vmem:[#allocation11] sm:$0xff] %v529_v20 }
 0x50d   :  { %838 = shalt.err (!%p835_p2)
}
 0x50e   :  { %s839_s19 = scalar_lea.hbm %s1066_s6, 128 }
 0x50f   :  { %p840_p3 = scmp.ne.s32.totalorder %s1066_s6, %s839_s19  ;;  %p843_p4 = scmp.lt.u32.totalorder %s839_s19, %s1066_s6 }
 0x511   :  { %p845_p5 = pnand %p843_p4, %p840_p3 }
 0x513   :  { %848 = shalt.err (!%p845_p5)
}
 0x514   :  { %540 = dma.vmem_to_hbm [thread:$0]  %s538_s15, 128, %s1066_s6, [#allocation4]  }
 0x515   :  { %855 = dma.done.wait [#allocation4], 128  }
 0x516   :  { %856 = vsyncadd [#allocation4], 4294967168 }
 0x517   :  { %544 = vsyncpa [#allocation3], 1 }
 0x518   :  { %545 = vsyncpa [#allocation6], 1 }
 0x519   :  { %546 = vsyncpa [#allocation9], 1 }
 0x51a   :  { %547 = vsyncpa [#allocation4], 1 }

</bundles_post_ra>
